<compile_context>
chip_gen: v6e
topology: v6e:2x2x1
jax: 0.10.0
libtpu: 0.0.40
codegen_flags: <defaults>
</compile_context>

<pallas_src>
import functools

import jax
import jax.numpy as jnp
from jax.experimental import pallas as pl
from jax.experimental.pallas import tpu as pltpu


def _round_up(n, m):
    return ((n + m - 1) // m) * m


def _mlp_kernel(x_ref, w1t_ref, b1_ref, w2t_ref, b2_ref, o_ref):
    # x_ref:  (block_b, In_p)   w1t_ref: (In_p, H_p)   b1_ref: (1, H_p)
    # w2t_ref:(H_p, Out_p)      b2_ref:  (1, Out_p)    o_ref:  (block_b, Out_p)
    x = x_ref[...]
    w1t = w1t_ref[...]
    w2t = w2t_ref[...]

    # linear1 + relu: MXU matmul with f32 accumulation, bias-add/relu on VPU in f32.
    h = jnp.dot(x, w1t, preferred_element_type=jnp.float32) + b1_ref[...]
    h = jnp.maximum(h, 0.0)

    # linear2 (cast the f32 activations back to the MXU operand dtype; this is a
    # no-op when everything is f32).
    out = jnp.dot(h.astype(w2t.dtype), w2t,
                  preferred_element_type=jnp.float32) + b2_ref[...]
    o_ref[...] = out.astype(o_ref.dtype)


@functools.partial(jax.jit, static_argnames=("block_b", "mxu_dtype"))
def linear_qnet_forward(x, w1, b1, w2, b2, *, block_b=128, mxu_dtype=None):
    """Fused 2-layer MLP forward (PyTorch LinearQNet semantics).

    x:  (B, In) float32
    w1: (H, In), b1: (H,), w2: (Out, H), b2: (Out,)   (PyTorch nn.Linear layout)
    block_b:   batch rows per grid step (batch axis is 'parallel').
    mxu_dtype: optional narrower dtype (e.g. jnp.bfloat16) for MXU operands only;
               accumulation, bias-add and relu stay in f32.
    returns (B, Out) in x's original dtype.
    """
    B, In = x.shape
    H = w1.shape[0]
    Out = w2.shape[0]
    out_dtype = x.dtype

    # Lane-dense padded shapes: last dims multiples of 128, batch multiple of block_b.
    In_p = _round_up(In, 128)
    H_p = _round_up(H, 128)
    Out_p = _round_up(Out, 128)
    block_b = max(8, int(block_b))
    B_p = _round_up(B, block_b)

    op_dtype = mxu_dtype if mxu_dtype is not None else x.dtype

    # Zero-pad and pre-transpose once outside the kernel (one-time XLA ops).
    x_p = jnp.zeros((B_p, In_p), op_dtype).at[:B, :In].set(x.astype(op_dtype))
    w1t_p = jnp.zeros((In_p, H_p), op_dtype).at[:In, :H].set(w1.T.astype(op_dtype))
    w2t_p = jnp.zeros((H_p, Out_p), op_dtype).at[:H, :Out].set(w2.T.astype(op_dtype))
    # Biases stay f32 (added to the f32 accumulator on the VPU).
    b1_p = jnp.zeros((1, H_p), jnp.float32).at[0, :H].set(b1.astype(jnp.float32))
    b2_p = jnp.zeros((1, Out_p), jnp.float32).at[0, :Out].set(b2.astype(jnp.float32))

    grid = (B_p // block_b,)

    out_p = pl.pallas_call(
        _mlp_kernel,
        out_shape=jax.ShapeDtypeStruct((B_p, Out_p), out_dtype),
        grid_spec=pltpu.PrefetchScalarGridSpec(
            num_scalar_prefetch=0,
            grid=grid,
            in_specs=[
                # x: tiled along the batch grid axis.
                pl.BlockSpec((block_b, In_p), lambda i: (i, 0)),
                # Weights/biases: same block for every grid step -> VMEM-resident.
                pl.BlockSpec((In_p, H_p), lambda i: (0, 0)),
                pl.BlockSpec((1, H_p), lambda i: (0, 0)),
                pl.BlockSpec((H_p, Out_p), lambda i: (0, 0)),
                pl.BlockSpec((1, Out_p), lambda i: (0, 0)),
            ],
            out_specs=pl.BlockSpec((block_b, Out_p), lambda i: (i, 0)),
        ),
        compiler_params=pltpu.CompilerParams(
            dimension_semantics=("parallel",),  # batch axis: megacore-shardable
        ),
    )(x_p, w1t_p, b1_p, w2t_p, b2_p)

    return out_p[:B, :Out]


def init_linear_params(key, out_features, in_features, dtype=jnp.float32):
    """Deterministic init mimicking torch.nn.Linear default:
    U(-1/sqrt(in_features), 1/sqrt(in_features)) for both weight and bias."""
    kw, kb = jax.random.split(key)
    bound = 1.0 / jnp.sqrt(jnp.asarray(in_features, dtype))
    w = jax.random.uniform(kw, (out_features, in_features), dtype, -bound, bound)
    b = jax.random.uniform(kb, (out_features,), dtype, -bound, bound)
    return w, b


if __name__ == "__main__":
    # Small shapes consistent with the snake Q-network usage:
    # input_size=11 (state vector), hidden_size=32, output_size=3 (actions).
    batch, input_size, hidden_size, output_size = 2, 11, 32, 3

    key = jax.random.PRNGKey(0)
    k_x, k_l1, k_l2 = jax.random.split(key, 3)

    x = jax.random.normal(k_x, (batch, input_size), jnp.float32)
    w1, b1 = init_linear_params(k_l1, hidden_size, input_size)
    w2, b2 = init_linear_params(k_l2, output_size, hidden_size)

    # Pure-JAX reference of the same semantics.
    ref = jnp.maximum(x @ w1.T + b1, 0.0) @ w2.T + b2

    # f32 path (exact semantics).
    out = linear_qnet_forward(x, w1, b1, w2, b2)
    out = jax.block_until_ready(out)
    assert out.shape == (batch, output_size)
    assert jnp.allclose(out, ref, atol=1e-5, rtol=1e-5)

    # bf16-MXU path (f32 accumulation / bias / relu) — looser tolerance.
    out_bf16 = linear_qnet_forward(x, w1, b1, w2, b2, mxu_dtype=jnp.bfloat16)
    out_bf16 = jax.block_until_ready(out_bf16)
    assert out_bf16.shape == (batch, output_size)
    assert jnp.allclose(out_bf16, ref, atol=5e-2, rtol=5e-2)

    # Larger replay-buffer-style batch exercising multiple grid steps.
    big_b = 512
    xb = jax.random.normal(jax.random.PRNGKey(1), (big_b, input_size), jnp.float32)
    out_big = jax.block_until_ready(
        linear_qnet_forward(xb, w1, b1, w2, b2, block_b=128))
    ref_big = jnp.maximum(xb @ w1.T + b1, 0.0) @ w2.T + b2
    assert out_big.shape == (big_b, output_size)
    assert jnp.allclose(out_big, ref_big, atol=1e-5, rtol=1e-5)

    print("KERNEL_OK")
</pallas_src>

<mosaic_0001>
module attributes {stable_mosaic.version = 11 : i64} {
  func.func @_mlp_kernel(%arg0: i32, %arg1: memref<128x128xf32, #tpu.memory_space<vmem>>, %arg2: memref<128x128xf32, #tpu.memory_space<vmem>>, %arg3: memref<1x128xf32, #tpu.memory_space<vmem>>, %arg4: memref<128x128xf32, #tpu.memory_space<vmem>>, %arg5: memref<1x128xf32, #tpu.memory_space<vmem>>, %arg6: memref<128x128xf32, #tpu.memory_space<vmem>>) attributes {dimension_semantics = [#tpu.dimension_semantics<parallel>], iteration_bounds = array<i64: 1>, scalar_prefetch = 0 : i64, scratch_operands = 0 : i64, tpu.core_type = #tpu.core_type<tc>, window_params = [{transform_indices = @transform_0, window_bounds = array<i64: 128, 128>}, {pipeline_mode = #tpu.pipeline_mode<synchronous>, transform_indices = @transform_1, window_bounds = array<i64: 128, 128>}, {pipeline_mode = #tpu.pipeline_mode<synchronous>, transform_indices = @transform_2, window_bounds = array<i64: 1, 128>}, {pipeline_mode = #tpu.pipeline_mode<synchronous>, transform_indices = @transform_3, window_bounds = array<i64: 128, 128>}, {pipeline_mode = #tpu.pipeline_mode<synchronous>, transform_indices = @transform_4, window_bounds = array<i64: 1, 128>}, {transform_indices = @transform_5, window_bounds = array<i64: 128, 128>}]} {
    %c0 = arith.constant 0 : index
    %c0_0 = arith.constant 0 : index
    %0 = vector.load %arg1[%c0, %c0_0] : memref<128x128xf32, #tpu.memory_space<vmem>>, vector<128x128xf32>
    %c0_1 = arith.constant 0 : index
    %c0_2 = arith.constant 0 : index
    %1 = vector.load %arg2[%c0_1, %c0_2] : memref<128x128xf32, #tpu.memory_space<vmem>>, vector<128x128xf32>
    %c0_3 = arith.constant 0 : index
    %c0_4 = arith.constant 0 : index
    %2 = vector.load %arg4[%c0_3, %c0_4] : memref<128x128xf32, #tpu.memory_space<vmem>>, vector<128x128xf32>
    %cst = arith.constant dense<0.000000e+00> : vector<128x128xf32>
    %3 = tpu.matmul %0, %1, %cst {dimension_numbers = #tpu.dot_dimension_numbers<[1], [0], [0], [1], [0, 0, 1, 1], [], []>} : vector<128x128xf32>, vector<128x128xf32>, vector<128x128xf32> -> vector<128x128xf32>
    %c0_5 = arith.constant 0 : index
    %c0_6 = arith.constant 0 : index
    %4 = vector.load %arg3[%c0_5, %c0_6] : memref<1x128xf32, #tpu.memory_space<vmem>>, vector<1x128xf32>
    %5 = vector.broadcast %4 : vector<1x128xf32> to vector<128x128xf32>
    %6 = arith.addf %3, %5 : vector<128x128xf32>
    %cst_7 = arith.constant 0.000000e+00 : f32
    %7 = vector.broadcast %cst_7 : f32 to vector<128x128xf32>
    %8 = arith.maximumf %6, %7 : vector<128x128xf32>
    %cst_8 = arith.constant dense<0.000000e+00> : vector<128x128xf32>
    %9 = tpu.matmul %8, %2, %cst_8 {dimension_numbers = #tpu.dot_dimension_numbers<[1], [0], [0], [1], [0, 0, 1, 1], [], []>} : vector<128x128xf32>, vector<128x128xf32>, vector<128x128xf32> -> vector<128x128xf32>
    %c0_9 = arith.constant 0 : index
    %c0_10 = arith.constant 0 : index
    %10 = vector.load %arg5[%c0_9, %c0_10] : memref<1x128xf32, #tpu.memory_space<vmem>>, vector<1x128xf32>
    %11 = vector.broadcast %10 : vector<1x128xf32> to vector<128x128xf32>
    %12 = arith.addf %9, %11 : vector<128x128xf32>
    %c0_11 = arith.constant 0 : index
    %c0_12 = arith.constant 0 : index
    %13 = vector.load %arg6[%c0_11, %c0_12] : memref<128x128xf32, #tpu.memory_space<vmem>>, vector<128x128xf32>
    tpu.vector_store %arg6[%c0_11, %c0_12], %12 {strides = array<i32>} : memref<128x128xf32, #tpu.memory_space<vmem>>, vector<128x128xf32>,
    return
  }
  func.func @transform_0(%arg0: i32) -> (i32, i32) {
    %c0_i32 = arith.constant 0 : i32
    %c0_i32_0 = arith.constant 0 : i32
    return %arg0, %c0_i32 : i32, i32
  }
  func.func @transform_1(%arg0: i32) -> (i32, i32) {
    %c0_i32 = arith.constant 0 : i32
    %c0_i32_0 = arith.constant 0 : i32
    %c0_i32_1 = arith.constant 0 : i32
    return %c0_i32, %c0_i32_0 : i32, i32
  }
  func.func @transform_2(%arg0: i32) -> (i32, i32) {
    %c0_i32 = arith.constant 0 : i32
    %c0_i32_0 = arith.constant 0 : i32
    %c0_i32_1 = arith.constant 0 : i32
    return %c0_i32, %c0_i32_0 : i32, i32
  }
  func.func @transform_3(%arg0: i32) -> (i32, i32) {
    %c0_i32 = arith.constant 0 : i32
    %c0_i32_0 = arith.constant 0 : i32
    %c0_i32_1 = arith.constant 0 : i32
    return %c0_i32, %c0_i32_0 : i32, i32
  }
  func.func @transform_4(%arg0: i32) -> (i32, i32) {
    %c0_i32 = arith.constant 0 : i32
    %c0_i32_0 = arith.constant 0 : i32
    %c0_i32_1 = arith.constant 0 : i32
    return %c0_i32, %c0_i32_0 : i32, i32
  }
  func.func @transform_5(%arg0: i32) -> (i32, i32) {
    %c0_i32 = arith.constant 0 : i32
    %c0_i32_0 = arith.constant 0 : i32
    return %arg0, %c0_i32 : i32, i32
  }
}

</mosaic_0001>

<bundles_post_ra>
// kernel: linear_qnet_forward.1
= control target key start
LH: loop header
LB: loop body
LE: loop exit
PB: predicated region body
PF: predicated region fallthrough
CT: control target
= control target key end

     0   :  { %s814_s1 = inlined_call_operand.vmem [shape: f32[128,128], index: 1, kind: input, shape index: {}]   ;;  %s815_s0 = inlined_call_operand.vmem [shape: f32[128,128], index: 0, kind: input, shape index: {}]   ;;  %s816_s3 = inlined_call_operand.vmem [shape: f32[128,128], index: 3, kind: input, shape index: {}]   ;;  %s817_s2 = inlined_call_operand.vmem [shape: f32[1,128], index: 2, kind: input, shape index: {}]   ;;  %s818_s4 = inlined_call_operand.vmem [shape: f32[1,128], index: 4, kind: input, shape index: {}]   ;;  %s819_s5 = inlined_call_operand.vmem [shape: f32[128,128], index: 5, kind: output, shape index: {}]  }
   0x1   :  { %v51_v0 = vld [vmem:[%s814_s1 + $0x78] sm:$0xff]  ;;  %v50_v1 = vld [vmem:[%s814_s1 + $0x70] sm:$0xff]  ;;  %v49_v2 = vld [vmem:[%s814_s1 + $0x68] sm:$0xff] }
   0x2   :  { %474 = vmatprep.subr.mxu0 %v51_v0  ;;  %v48_v3 = vld [vmem:[%s814_s1 + $0x60] sm:$0xff]  ;;  %v47_v5 = vld [vmem:[%s814_s1 + $0x58] sm:$0xff]  ;;  %v46_v6 = vld [vmem:[%s814_s1 + $0x50] sm:$0xff] }
   0x3   :  { %475 = vmatpush3.msra.mxu0 %v51_v0  ;;  %v20_v4 = vld [vmem:[%s815_s0] sm:$0xff]  ;;  %v45_v7 = vld [vmem:[%s814_s1 + $0x48] sm:$0xff]  ;;  %v67_v8 = vld [vmem:[%s816_s3 + $0x78] sm:$0xff] }
   0x4   :  { %476 = vmatprep.subr.mxu0 %v50_v1  ;;  %506 = vmatprep.mubr.f32.mxu0 %v20_v4  ;;  %v66_v9 = vld [vmem:[%s816_s3 + $0x70] sm:$0xff]  ;;  %v44_v10 = vld [vmem:[%s814_s1 + $0x40] sm:$0xff]  ;;  %v65_v11 = vld [vmem:[%s816_s3 + $0x68] sm:$0xff] }
   0x5   :  { %477 = vmatpush3.msra.mxu0 %v50_v1  ;;  %530 = vmatprep.subr.mxu1 %v67_v8  ;;  %v43_v12 = vld [vmem:[%s814_s1 + $0x38] sm:$0xff]  ;;  %v64_v13 = vld [vmem:[%s816_s3 + $0x60] sm:$0xff]  ;;  %v42_v14 = vld [vmem:[%s814_s1 + $0x30] sm:$0xff] }
   0x6   :  { %478 = vmatprep.subr.mxu0 %v49_v2  ;;  %531 = vmatpush3.msra.mxu1 %v67_v8  ;;  %v63_v15 = vld [vmem:[%s816_s3 + $0x58] sm:$0xff]  ;;  %v41_v16 = vld [vmem:[%s814_s1 + $0x28] sm:$0xff]  ;;  %v62_v17 = vld [vmem:[%s816_s3 + $0x50] sm:$0xff] }
   0x7   :  { %479 = vmatpush3.msra.mxu0 %v49_v2  ;;  %532 = vmatprep.subr.mxu1 %v66_v9  ;;  %v40_v18 = vld [vmem:[%s814_s1 + $0x20] sm:$0xff]  ;;  %v61_v19 = vld [vmem:[%s816_s3 + $0x48] sm:$0xff]  ;;  %v39_v20 = vld [vmem:[%s814_s1 + $0x18] sm:$0xff] }
   0x8   :  { %480 = vmatprep.subr.mxu0 %v48_v3  ;;  %533 = vmatpush3.msra.mxu1 %v66_v9  ;;  %v60_v21 = vld [vmem:[%s816_s3 + $0x40] sm:$0xff]  ;;  %v38_v22 = vld [vmem:[%s814_s1 + $0x10] sm:$0xff]  ;;  %v59_v23 = vld [vmem:[%s816_s3 + $0x38] sm:$0xff] }
   0x9   :  { %481 = vmatpush3.msra.mxu0 %v48_v3  ;;  %534 = vmatprep.subr.mxu1 %v65_v11  ;;  %v37_v24 = vld [vmem:[%s814_s1 + $0x8] sm:$0xff]  ;;  %v58_v25 = vld [vmem:[%s816_s3 + $0x30] sm:$0xff]  ;;  %v36_v26 = vld [vmem:[%s814_s1] sm:$0xff] }
   0xa   :  { %482 = vmatprep.subr.mxu0 %v47_v5  ;;  %535 = vmatpush3.msra.mxu1 %v65_v11  ;;  %v57_v27 = vld [vmem:[%s816_s3 + $0x28] sm:$0xff]  ;;  %v56_v29 = vld [vmem:[%s816_s3 + $0x20] sm:$0xff]  ;;  %v22_v30 = vld [vmem:[%s815_s0 + $0x10] sm:$0xff] }
   0xb   :  { %483 = vmatpush3.msra.mxu0 %v47_v5  ;;  %536 = vmatprep.subr.mxu1 %v64_v13  ;;  %v21_v28 = vld [vmem:[%s815_s0 + $0x8] sm:$0xff]  ;;  %v23_v31 = vld [vmem:[%s815_s0 + $0x18] sm:$0xff]  ;;  %v24_v32 = vld [vmem:[%s815_s0 + $0x20] sm:$0xff] }
   0xc   :  { %484 = vmatprep.subr.mxu0 %v46_v6  ;;  %537 = vmatpush3.msra.mxu1 %v64_v13  ;;  %v25_v33 = vld [vmem:[%s815_s0 + $0x28] sm:$0xff]  ;;  %v26_v34 = vld [vmem:[%s815_s0 + $0x30] sm:$0xff]  ;;  %v27_v35 = vld [vmem:[%s815_s0 + $0x38] sm:$0xff] }
   0xd   :  { %485 = vmatpush3.msra.mxu0 %v46_v6  ;;  %538 = vmatprep.subr.mxu1 %v63_v15  ;;  %v28_v36 = vld [vmem:[%s815_s0 + $0x40] sm:$0xff]  ;;  %v29_v37 = vld [vmem:[%s815_s0 + $0x48] sm:$0xff]  ;;  %v30_v38 = vld [vmem:[%s815_s0 + $0x50] sm:$0xff] }
   0xe   :  { %486 = vmatprep.subr.mxu0 %v45_v7  ;;  %539 = vmatpush3.msra.mxu1 %v63_v15  ;;  %v31_v39 = vld [vmem:[%s815_s0 + $0x58] sm:$0xff]  ;;  %v32_v40 = vld [vmem:[%s815_s0 + $0x60] sm:$0xff]  ;;  %v33_v41 = vld [vmem:[%s815_s0 + $0x68] sm:$0xff] }
   0xf   :  { %487 = vmatpush3.msra.mxu0 %v45_v7  ;;  %540 = vmatprep.subr.mxu1 %v62_v17  ;;  %v34_v42 = vld [vmem:[%s815_s0 + $0x70] sm:$0xff]  ;;  %v35_v43 = vld [vmem:[%s815_s0 + $0x78] sm:$0xff]  ;;  %v53_v46 = vld [vmem:[%s816_s3 + $0x8] sm:$0xff] }
  0x10   :  { %488 = vmatprep.subr.mxu0 %v44_v10  ;;  %541 = vmatpush3.msra.mxu1 %v62_v17  ;;  %v55_v44 = vld [vmem:[%s816_s3 + $0x18] sm:$0xff]  ;;  %v54_v45 = vld [vmem:[%s816_s3 + $0x10] sm:$0xff]  ;;  %v52_v47 = vld [vmem:[%s816_s3] sm:$0xff] }
  0x11   :  { %489 = vmatpush3.msra.mxu0 %v44_v10  ;;  %542 = vmatprep.subr.mxu1 %v61_v19  ;;  %v408_v48 = vld [vmem:[%s817_s2] ss:$0 sm:$0xff] }
  0x12   :  { %490 = vmatprep.subr.mxu0 %v43_v12  ;;  %543 = vmatpush3.msra.mxu1 %v61_v19 }
  0x13   :  { %491 = vmatpush3.msra.mxu0 %v43_v12  ;;  %544 = vmatprep.subr.mxu1 %v60_v21 }
  0x14   :  { %492 = vmatprep.subr.mxu0 %v42_v14  ;;  %545 = vmatpush3.msra.mxu1 %v60_v21 }
  0x15   :  { %493 = vmatpush3.msra.mxu0 %v42_v14  ;;  %546 = vmatprep.subr.mxu1 %v59_v23 }
  0x16   :  { %494 = vmatprep.subr.mxu0 %v41_v16  ;;  %547 = vmatpush3.msra.mxu1 %v59_v23 }
  0x17   :  { %495 = vmatpush3.msra.mxu0 %v41_v16  ;;  %548 = vmatprep.subr.mxu1 %v58_v25 }
  0x18   :  { %496 = vmatprep.subr.mxu0 %v40_v18  ;;  %549 = vmatpush3.msra.mxu1 %v58_v25 }
  0x19   :  { %497 = vmatpush3.msra.mxu0 %v40_v18  ;;  %550 = vmatprep.subr.mxu1 %v57_v27 }
  0x1a   :  { %498 = vmatprep.subr.mxu0 %v39_v20  ;;  %551 = vmatpush3.msra.mxu1 %v57_v27 }
  0x1b   :  { %499 = vmatpush3.msra.mxu0 %v39_v20  ;;  %552 = vmatprep.subr.mxu1 %v56_v29 }
  0x1c   :  { %500 = vmatprep.subr.mxu0 %v38_v22  ;;  %553 = vmatpush3.msra.mxu1 %v56_v29 }
  0x1d   :  { %501 = vmatpush3.msra.mxu0 %v38_v22  ;;  %554 = vmatprep.subr.mxu1 %v55_v44 }
  0x1e   :  { %502 = vmatprep.subr.mxu0 %v37_v24  ;;  %555 = vmatpush3.msra.mxu1 %v55_v44 }
  0x1f   :  { %503 = vmatpush3.msra.mxu0 %v37_v24  ;;  %556 = vmatprep.subr.mxu1 %v54_v45 }
  0x20   :  { %504 = vmatprep.subr.mxu0 %v36_v26  ;;  %557 = vmatpush3.msra.mxu1 %v54_v45 }
  0x21   :  { %505 = vmatpush3.msra.mxu0 %v36_v26  ;;  %558 = vmatprep.subr.mxu1 %v53_v46 }
  0x22   :  { %507 = vmatmul.mubr.f32.vlgmr.msra.gmra.mxu0 %v21_v28  ;;  %559 = vmatpush3.msra.mxu1 %v53_v46 }
  0x23   :  { %509 = vmatprep.mubr.f32.mxu0 %v22_v30  ;;  %560 = vmatprep.subr.mxu1 %v52_v47 }
  0x24   :  { %561 = vmatpush3.msra.mxu1 %v52_v47 }
  0x26   :  { %510 = vmatmul.mubr.f32.gmra.mxu0 %v23_v31 }
  0x27   :  { %512 = vmatprep.mubr.f32.mxu0 %v24_v32 }
  0x2a   :  { %513 = vmatmul.mubr.f32.gmra.mxu0 %v25_v33  ;;  %v409_v33 = vld [vmem:[%s818_s4] ss:$0 sm:$0xff] }
  0x2b   :  { %515 = vmatprep.mubr.f32.mxu0 %v26_v34 }
  0x2e   :  { %516 = vmatmul.mubr.f32.gmra.mxu0 %v27_v35 }
  0x2f   :  { %518 = vmatprep.mubr.f32.mxu0 %v28_v36 }
  0x32   :  { %519 = vmatmul.mubr.f32.gmra.mxu0 %v29_v37 }
  0x33   :  { %521 = vmatprep.mubr.f32.mxu0 %v30_v38 }
  0x36   :  { %522 = vmatmul.mubr.f32.gmra.mxu0 %v31_v39 }
  0x37   :  { %524 = vmatprep.mubr.f32.mxu0 %v32_v40 }
  0x3a   :  { %525 = vmatmul.mubr.f32.gmra.mxu0 %v33_v41 }
  0x3b   :  { %527 = vmatprep.mubr.f32.mxu0 %v34_v42 }
  0x3e   :  { %528 = vmatmul.mubr.f32.gmra.mxu0 %v35_v43 }
  0xe2   :  { %v508_v49 = vpop.f32.mrf.mxu0 }
  0xe3   :  { %v147_v50 = vadd.f32 %v508_v49, %v408_v48 }
  0xe4   :  { %v141_v51 = vpop.f32.mrf.mxu0 }
  0xe5   :  { %v142_v52 = vadd.f32 %v408_v48, %v141_v51  ;;  %v221_v55 = vmax.f32 %v147_v50, 0.0 }
  0xe6   :  { %v511_v53 = vpop.f32.mrf.mxu0 }
  0xe7   :  { %v220_v54 = vmax.f32 %v142_v52, 0.0  ;;  %v157_v56 = vadd.f32 %v511_v53, %v408_v48 }
  0xe8   :  { %v151_v57 = vpop.f32.mrf.mxu0 }
  0xe9   :  { %v152_v58 = vadd.f32 %v408_v48, %v151_v57  ;;  %562 = vmatprep.mubr.f32.mxu1 %v220_v54  ;;  %v223_v61 = vmax.f32 %v157_v56, 0.0 }
  0xea   :  { %v514_v59 = vpop.f32.mrf.mxu0  ;;  %563 = vmatmul.mubr.f32.vlgmr.msra.gmra.mxu1 %v221_v55 }
  0xeb   :  { %v222_v60 = vmax.f32 %v152_v58, 0.0  ;;  %v167_v62 = vadd.f32 %v514_v59, %v408_v48 }
  0xec   :  { %v161_v63 = vpop.f32.mrf.mxu0 }
  0xed   :  { %v162_v0 = vadd.f32 %v408_v48, %v161_v63  ;;  %565 = vmatprep.mubr.f32.mxu1 %v222_v60  ;;  %v225_v3 = vmax.f32 %v167_v62, 0.0 }
  0xee   :  { %v517_v1 = vpop.f32.mrf.mxu0  ;;  %566 = vmatmul.mubr.f32.gmra.mxu1 %v223_v61 }
  0xef   :  { %v224_v2 = vmax.f32 %v162_v0, 0.0  ;;  %v177_v4 = vadd.f32 %v517_v1, %v408_v48 }
  0xf0   :  { %v171_v5 = vpop.f32.mrf.mxu0 }
  0xf1   :  { %v172_v6 = vadd.f32 %v408_v48, %v171_v5  ;;  %568 = vmatprep.mubr.f32.mxu1 %v224_v2  ;;  %v227_v9 = vmax.f32 %v177_v4, 0.0 }
  0xf2   :  { %v520_v7 = vpop.f32.mrf.mxu0  ;;  %569 = vmatmul.mubr.f32.gmra.mxu1 %v225_v3 }
  0xf3   :  { %v226_v8 = vmax.f32 %v172_v6, 0.0  ;;  %v187_v10 = vadd.f32 %v520_v7, %v408_v48 }
  0xf4   :  { %v181_v11 = vpop.f32.mrf.mxu0 }
  0xf5   :  { %v182_v12 = vadd.f32 %v408_v48, %v181_v11  ;;  %571 = vmatprep.mubr.f32.mxu1 %v226_v8  ;;  %v229_v15 = vmax.f32 %v187_v10, 0.0 }
  0xf6   :  { %v523_v13 = vpop.f32.mrf.mxu0  ;;  %572 = vmatmul.mubr.f32.gmra.mxu1 %v227_v9 }
  0xf7   :  { %v228_v14 = vmax.f32 %v182_v12, 0.0  ;;  %v197_v16 = vadd.f32 %v523_v13, %v408_v48 }
  0xf8   :  { %v191_v17 = vpop.f32.mrf.mxu0 }
  0xf9   :  { %v192_v18 = vadd.f32 %v408_v48, %v191_v17  ;;  %574 = vmatprep.mubr.f32.mxu1 %v228_v14  ;;  %v231_v21 = vmax.f32 %v197_v16, 0.0 }
  0xfa   :  { %v526_v19 = vpop.f32.mrf.mxu0  ;;  %575 = vmatmul.mubr.f32.gmra.mxu1 %v229_v15 }
  0xfb   :  { %v230_v20 = vmax.f32 %v192_v18, 0.0  ;;  %v207_v22 = vadd.f32 %v526_v19, %v408_v48 }
  0xfc   :  { %v201_v23 = vpop.f32.mrf.mxu0 }
  0xfd   :  { %v202_v24 = vadd.f32 %v408_v48, %v201_v23  ;;  %577 = vmatprep.mubr.f32.mxu1 %v230_v20  ;;  %v233_v27 = vmax.f32 %v207_v22, 0.0 }
  0xfe   :  { %v529_v25 = vpop.f32.mrf.mxu0  ;;  %578 = vmatmul.mubr.f32.gmra.mxu1 %v231_v21 }
  0xff   :  { %v232_v26 = vmax.f32 %v202_v24, 0.0  ;;  %v217_v28 = vadd.f32 %v529_v25, %v408_v48 }
 0x100   :  { %v211_v29 = vpop.f32.mrf.mxu0 }
 0x101   :  { %v212_v30 = vadd.f32 %v408_v48, %v211_v29  ;;  %580 = vmatprep.mubr.f32.mxu1 %v232_v26  ;;  %v235_v32 = vmax.f32 %v217_v28, 0.0 }
 0x102   :  { %581 = vmatmul.mubr.f32.gmra.mxu1 %v233_v27 }
 0x103   :  { %v234_v31 = vmax.f32 %v212_v30, 0.0 }
 0x105   :  { %583 = vmatprep.mubr.f32.mxu1 %v234_v31 }
 0x106   :  { %584 = vmatmul.mubr.f32.gmra.mxu1 %v235_v32 }
 0x1aa   :  { %v564_v34 = vpop.f32.mrf.mxu1 }
 0x1ab   :  { %v315_v35 = vadd.f32 %v564_v34, %v409_v33 }
 0x1ac   :  { %v309_v36 = vpop.f32.mrf.mxu1 }
 0x1ad   :  { %389 = vst [vmem:[%s819_s5 + $0x8] sm:$0xff] %v315_v35  ;;  %v310_v37 = vadd.f32 %v409_v33, %v309_v36 }
 0x1ae   :  { %v567_v38 = vpop.f32.mrf.mxu1 }
 0x1af   :  { %388 = vst [vmem:[%s819_s5] sm:$0xff] %v310_v37  ;;  %v325_v39 = vadd.f32 %v567_v38, %v409_v33 }
 0x1b0   :  { %v319_v40 = vpop.f32.mrf.mxu1 }
 0x1b1   :  { %391 = vst [vmem:[%s819_s5 + $0x18] sm:$0xff] %v325_v39  ;;  %v320_v41 = vadd.f32 %v409_v33, %v319_v40 }
 0x1b2   :  { %v570_v42 = vpop.f32.mrf.mxu1 }
 0x1b3   :  { %390 = vst [vmem:[%s819_s5 + $0x10] sm:$0xff] %v320_v41  ;;  %v335_v43 = vadd.f32 %v570_v42, %v409_v33 }
 0x1b4   :  { %v329_v44 = vpop.f32.mrf.mxu1 }
 0x1b5   :  { %393 = vst [vmem:[%s819_s5 + $0x28] sm:$0xff] %v335_v43  ;;  %v330_v45 = vadd.f32 %v409_v33, %v329_v44 }
 0x1b6   :  { %v573_v46 = vpop.f32.mrf.mxu1 }
 0x1b7   :  { %392 = vst [vmem:[%s819_s5 + $0x20] sm:$0xff] %v330_v45  ;;  %v345_v47 = vadd.f32 %v573_v46, %v409_v33 }
 0x1b8   :  { %v339_v48 = vpop.f32.mrf.mxu1 }
 0x1b9   :  { %395 = vst [vmem:[%s819_s5 + $0x38] sm:$0xff] %v345_v47  ;;  %v340_v49 = vadd.f32 %v409_v33, %v339_v48 }
 0x1ba   :  { %v576_v50 = vpop.f32.mrf.mxu1 }
 0x1bb   :  { %394 = vst [vmem:[%s819_s5 + $0x30] sm:$0xff] %v340_v49  ;;  %v355_v51 = vadd.f32 %v576_v50, %v409_v33 }
 0x1bc   :  { %v349_v52 = vpop.f32.mrf.mxu1 }
 0x1bd   :  { %397 = vst [vmem:[%s819_s5 + $0x48] sm:$0xff] %v355_v51  ;;  %v350_v53 = vadd.f32 %v409_v33, %v349_v52 }
 0x1be   :  { %v579_v54 = vpop.f32.mrf.mxu1 }
 0x1bf   :  { %396 = vst [vmem:[%s819_s5 + $0x40] sm:$0xff] %v350_v53  ;;  %v365_v55 = vadd.f32 %v579_v54, %v409_v33 }
 0x1c0   :  { %v359_v56 = vpop.f32.mrf.mxu1 }
 0x1c1   :  { %399 = vst [vmem:[%s819_s5 + $0x58] sm:$0xff] %v365_v55  ;;  %v360_v57 = vadd.f32 %v409_v33, %v359_v56 }
 0x1c2   :  { %v582_v58 = vpop.f32.mrf.mxu1 }
 0x1c3   :  { %398 = vst [vmem:[%s819_s5 + $0x50] sm:$0xff] %v360_v57  ;;  %v375_v59 = vadd.f32 %v582_v58, %v409_v33 }
 0x1c4   :  { %v369_v60 = vpop.f32.mrf.mxu1 }
 0x1c5   :  { %401 = vst [vmem:[%s819_s5 + $0x68] sm:$0xff] %v375_v59  ;;  %v370_v61 = vadd.f32 %v409_v33, %v369_v60 }
 0x1c6   :  { %v585_v62 = vpop.f32.mrf.mxu1 }
 0x1c7   :  { %400 = vst [vmem:[%s819_s5 + $0x60] sm:$0xff] %v370_v61  ;;  %v385_v63 = vadd.f32 %v585_v62, %v409_v33 }
 0x1c8   :  { %v379_v0 = vpop.f32.mrf.mxu1 }
 0x1c9   :  { %403 = vst [vmem:[%s819_s5 + $0x78] sm:$0xff] %v385_v63  ;;  %v380_v1 = vadd.f32 %v409_v33, %v379_v0 }
 0x1cb   :  { %402 = vst [vmem:[%s819_s5 + $0x70] sm:$0xff] %v380_v1 }

</bundles_post_ra>
